<compile_context>
chip_gen: v5e
topology: v5e:2x2
jax: 0.10.0
libtpu: 0.0.40
codegen_flags: <defaults>
</compile_context>

<pallas_src>
import functools

import jax
import jax.numpy as jnp
from jax.experimental import pallas as pl
from jax.experimental.pallas import tpu as pltpu

_INV_SQRT2 = 0.7071067811865476


def _gelu_f32(x):
    """Exact (erf) GELU in float32, matching torch.nn.functional.gelu default."""
    xf = x.astype(jnp.float32)
    return 0.5 * xf * (1.0 + jax.lax.erf(xf * _INV_SQRT2))


def _same_pad_conv(act_f32, w, b, *, K, dilation, pad, L, compute_dtype):
    """One SamePadConv on a pre-activated (C, L) slab, entirely in VMEM/vregs.

    act_f32 : (C, L)       f32, already GELU'd (gelu(0)==0 => zero pad is exact).
    w       : (Cout, K*C)  rows ordered (tap k major, channel minor).
    b       : (Cout, 1)
    returns : (Cout, L)    f32
    """
    C = act_f32.shape[0]
    a = act_f32.astype(compute_dtype)                      # MXU-native dtype
    if pad > 0:
        z = jnp.zeros((C, pad), a.dtype)
        a = jnp.concatenate([z, a, z], axis=1)             # (C, L + 2*pad)
    # im2col: K dilated shifted views stacked on the sublane axis -> one fat matmul.
    cols = jnp.concatenate(
        [a[:, k * dilation:k * dilation + L] for k in range(K)], axis=0)  # (K*C, L)
    out = jnp.dot(w, cols, preferred_element_type=jnp.float32)            # (Cout, L)
    return out + b.astype(jnp.float32)


def _make_convblock_kernel(K, dilation, pad, L, has_proj):
    def kernel(*refs):
        if has_proj:
            x_ref, w1_ref, b1_ref, w2_ref, b2_ref, pw_ref, pb_ref, o_ref = refs
        else:
            x_ref, w1_ref, b1_ref, w2_ref, b2_ref, o_ref = refs

        x = x_ref[0]                                       # (Cin, L), native dtype
        cdt = x.dtype

        # Residual path: 1x1-conv projector or identity (Cin == Cout then).
        if has_proj:
            res = jnp.dot(pw_ref[...], x, preferred_element_type=jnp.float32)
            res = res + pb_ref[...].astype(jnp.float32)
        else:
            res = x.astype(jnp.float32)

        # conv1(gelu(x)) and conv2(gelu(h)); h stays on-chip.
        h = _same_pad_conv(_gelu_f32(x), w1_ref[...], b1_ref[...],
                           K=K, dilation=dilation, pad=pad, L=L, compute_dtype=cdt)
        y = _same_pad_conv(_gelu_f32(h), w2_ref[...], b2_ref[...],
                           K=K, dilation=dilation, pad=pad, L=L, compute_dtype=cdt)

        o_ref[0] = (y + res).astype(o_ref.dtype)

    return kernel


@functools.partial(jax.jit, static_argnames=("kernel_size", "dilation"))
def conv_block_forward(x_ncl, params, *, kernel_size, dilation):
    """x_ncl: (B, Cin, L) -> (B, Cout, L), same NCL convention as PyTorch."""
    B, Cin, L = x_ncl.shape
    Cout = params["b1"].shape[0]
    receptive_field = (kernel_size - 1) * dilation + 1
    pad = receptive_field // 2
    has_proj = params["proj_w"] is not None

    kernel = _make_convblock_kernel(kernel_size, dilation, pad, L, has_proj)

    inputs = [x_ncl,
              params["w1"], params["b1"].reshape(Cout, 1),
              params["w2"], params["b2"].reshape(Cout, 1)]
    in_specs = [
        pl.BlockSpec((1, Cin, L), lambda b: (b, 0, 0)),
        pl.BlockSpec((Cout, kernel_size * Cin), lambda b: (0, 0)),
        pl.BlockSpec((Cout, 1), lambda b: (0, 0)),
        pl.BlockSpec((Cout, kernel_size * Cout), lambda b: (0, 0)),
        pl.BlockSpec((Cout, 1), lambda b: (0, 0)),
    ]
    if has_proj:
        inputs += [params["proj_w"], params["proj_b"].reshape(Cout, 1)]
        in_specs += [pl.BlockSpec((Cout, Cin), lambda b: (0, 0)),
                     pl.BlockSpec((Cout, 1), lambda b: (0, 0))]

    # TODO(synk): for very long sequences, add an L grid axis with a
    # (conv1+conv2) halo via manual make_async_copy so the per-step VMEM block
    # stays bounded on v7x (64 MiB) and both TCs get many parallel tiles.
    return pl.pallas_call(
        kernel,
        out_shape=jax.ShapeDtypeStruct((B, Cout, L), x_ncl.dtype),
        grid=(B,),
        in_specs=in_specs,
        out_specs=pl.BlockSpec((1, Cout, L), lambda b: (b, 0, 0)),
        compiler_params=pltpu.CompilerParams(
            dimension_semantics=("parallel",),
            vmem_limit_bytes=32 * 1024 * 1024),
    )(*inputs)


def init_conv_block_params(key, in_channels, out_channels, kernel_size,
                           final=False, dtype=jnp.float32):
    """Deterministic synthetic params.  Conv weights are stored pre-flattened as
    (Cout, K*Cin) with rows ordered (tap k major, input channel minor), matching
    the kernel's im2col layout."""
    k1, k2, k3, k4, k5, k6 = jax.random.split(key, 6)
    scale = 0.1

    def conv_w_flat(k, cout, cin, ks):
        w = jax.random.normal(k, (cout, cin, ks), dtype) * scale    # PyTorch (O,I,K)
        return jnp.transpose(w, (0, 2, 1)).reshape(cout, ks * cin)  # -> (O, K*I)

    params = {
        "w1": conv_w_flat(k1, out_channels, in_channels, kernel_size),
        "b1": jax.random.normal(k2, (out_channels,), dtype) * scale,
        "w2": conv_w_flat(k3, out_channels, out_channels, kernel_size),
        "b2": jax.random.normal(k4, (out_channels,), dtype) * scale,
    }
    if in_channels != out_channels or final:
        params["proj_w"] = conv_w_flat(k5, out_channels, in_channels, 1)  # (O, I)
        params["proj_b"] = jax.random.normal(k6, (out_channels,), dtype) * scale
    else:
        params["proj_w"] = None
        params["proj_b"] = None
    return params


def _ref_conv_block(x, params, kernel_size, dilation):
    """Pure-JAX reference mirroring the PyTorch ConvBlock (correctness check)."""
    Cin = x.shape[1]
    Cout = params["b1"].shape[0]
    rf = (kernel_size - 1) * dilation + 1
    pad = rf // 2
    remove = 1 if rf % 2 == 0 else 0

    def conv1d(x, w_oik, b, dil, p, rem):
        y = jax.lax.conv_general_dilated(
            x, w_oik, window_strides=(1,), padding=[(p, p)], rhs_dilation=(dil,),
            dimension_numbers=("NCH", "OIH", "NCH"))
        y = y + b[None, :, None]
        return y[:, :, :-rem] if rem else y

    def unflatten(w_flat, K, Ci):
        Co = w_flat.shape[0]
        return jnp.transpose(w_flat.reshape(Co, K, Ci), (0, 2, 1))  # (O, I, K)

    if params["proj_w"] is not None:
        res = conv1d(x, params["proj_w"][:, :, None], params["proj_b"], 1, 0, 0)
    else:
        res = x
    g = jax.nn.gelu(x, approximate=False)
    h = conv1d(g, unflatten(params["w1"], kernel_size, Cin), params["b1"],
               dilation, pad, remove)
    g2 = jax.nn.gelu(h, approximate=False)
    y = conv1d(g2, unflatten(params["w2"], kernel_size, Cout), params["b2"],
               dilation, pad, remove)
    return y + res


if __name__ == "__main__":
    B, C_in, C_out, L = 2, 4, 8, 16
    kernel_size, dilation = 3, 2

    key = jax.random.PRNGKey(0)
    kx, kp = jax.random.split(key)
    x = jax.random.normal(kx, (B, C_in, L), jnp.float32)   # NCL, like PyTorch

    params = init_conv_block_params(kp, C_in, C_out, kernel_size, final=False)

    y = conv_block_forward(x, params, kernel_size=kernel_size, dilation=dilation)
    jax.block_until_ready(y)
    assert y.shape == (B, C_out, L)

    y_ref = _ref_conv_block(x, params, kernel_size, dilation)
    assert jnp.allclose(y, y_ref, rtol=2e-2, atol=2e-2), \
        float(jnp.max(jnp.abs(y - y_ref)))

    print("KERNEL_OK")
</pallas_src>

<mosaic_0001>
module attributes {stable_mosaic.version = 11 : i64} {
  func.func @kernel(%arg0: i32, %arg1: memref<1x4x16xf32, #tpu.memory_space<vmem>>, %arg2: memref<8x12xf32, #tpu.memory_space<vmem>>, %arg3: memref<8x1xf32, #tpu.memory_space<vmem>>, %arg4: memref<8x24xf32, #tpu.memory_space<vmem>>, %arg5: memref<8x1xf32, #tpu.memory_space<vmem>>, %arg6: memref<8x4xf32, #tpu.memory_space<vmem>>, %arg7: memref<8x1xf32, #tpu.memory_space<vmem>>, %arg8: memref<1x8x16xf32, #tpu.memory_space<vmem>>) attributes {dimension_semantics = [#tpu.dimension_semantics<parallel>], iteration_bounds = array<i64: 2>, scalar_prefetch = 0 : i64, scratch_operands = 0 : i64, tpu.core_type = #tpu.core_type<tc>, window_params = [{transform_indices = @transform_0, window_bounds = array<i64: 1, 4, 16>}, {pipeline_mode = #tpu.pipeline_mode<synchronous>, transform_indices = @transform_1, window_bounds = array<i64: 8, 12>}, {pipeline_mode = #tpu.pipeline_mode<synchronous>, transform_indices = @transform_2, window_bounds = array<i64: 8, 1>}, {pipeline_mode = #tpu.pipeline_mode<synchronous>, transform_indices = @transform_3, window_bounds = array<i64: 8, 24>}, {pipeline_mode = #tpu.pipeline_mode<synchronous>, transform_indices = @transform_4, window_bounds = array<i64: 8, 1>}, {pipeline_mode = #tpu.pipeline_mode<synchronous>, transform_indices = @transform_5, window_bounds = array<i64: 8, 4>}, {pipeline_mode = #tpu.pipeline_mode<synchronous>, transform_indices = @transform_6, window_bounds = array<i64: 8, 1>}, {transform_indices = @transform_7, window_bounds = array<i64: 1, 8, 16>}]} {
    %c0 = arith.constant 0 : index
    %c0_0 = arith.constant 0 : index
    %c0_1 = arith.constant 0 : index
    %0 = vector.load %arg1[%c0, %c0_0, %c0_1] : memref<1x4x16xf32, #tpu.memory_space<vmem>>, vector<1x4x16xf32>
    %1 = vector.shape_cast %0 : vector<1x4x16xf32> to vector<4x16xf32>
    %c0_2 = arith.constant 0 : index
    %c0_3 = arith.constant 0 : index
    %2 = vector.load %arg6[%c0_2, %c0_3] : memref<8x4xf32, #tpu.memory_space<vmem>>, vector<8x4xf32>
    %cst = arith.constant dense<0.000000e+00> : vector<8x16xf32>
    %3 = tpu.matmul %2, %1, %cst {dimension_numbers = #tpu.dot_dimension_numbers<[1], [0], [0], [1], [0, 0, 1, 1], [], []>} : vector<8x4xf32>, vector<4x16xf32>, vector<8x16xf32> -> vector<8x16xf32>
    %c0_4 = arith.constant 0 : index
    %c0_5 = arith.constant 0 : index
    %4 = vector.load %arg7[%c0_4, %c0_5] : memref<8x1xf32, #tpu.memory_space<vmem>>, vector<8x1xf32>
    %5 = vector.broadcast %4 : vector<8x1xf32> to vector<8x16xf32>
    %6 = arith.addf %3, %5 : vector<8x16xf32>
    %cst_6 = arith.constant 5.000000e-01 : f32
    %7 = vector.broadcast %cst_6 : f32 to vector<4x16xf32>
    %8 = arith.mulf %7, %1 : vector<4x16xf32>
    %cst_7 = arith.constant 0.707106769 : f32
    %9 = vector.broadcast %cst_7 : f32 to vector<4x16xf32>
    %10 = arith.mulf %1, %9 : vector<4x16xf32>
    %11 = math.erf %10 : vector<4x16xf32>
    %cst_8 = arith.constant 1.000000e+00 : f32
    %12 = vector.broadcast %cst_8 : f32 to vector<4x16xf32>
    %13 = arith.addf %12, %11 : vector<4x16xf32>
    %14 = arith.mulf %8, %13 : vector<4x16xf32>
    %c0_9 = arith.constant 0 : index
    %c0_10 = arith.constant 0 : index
    %15 = vector.load %arg2[%c0_9, %c0_10] : memref<8x12xf32, #tpu.memory_space<vmem>>, vector<8x12xf32>
    %c0_11 = arith.constant 0 : index
    %c0_12 = arith.constant 0 : index
    %16 = vector.load %arg3[%c0_11, %c0_12] : memref<8x1xf32, #tpu.memory_space<vmem>>, vector<8x1xf32>
    %cst_13 = arith.constant 0.000000e+00 : f32
    %17 = vector.broadcast %cst_13 : f32 to vector<4x2xf32>
    %18 = tpu.concatenate %17, %14, %17 in 1 : vector<4x2xf32>, vector<4x16xf32>, vector<4x2xf32> -> vector<4x20xf32>
    %19 = vector.extract_strided_slice %18 {offsets = [0, 0], sizes = [4, 16], strides = [1, 1]} : vector<4x20xf32> to vector<4x16xf32>
    %20 = vector.extract_strided_slice %18 {offsets = [0, 2], sizes = [4, 16], strides = [1, 1]} : vector<4x20xf32> to vector<4x16xf32>
    %21 = vector.extract_strided_slice %18 {offsets = [0, 4], sizes = [4, 16], strides = [1, 1]} : vector<4x20xf32> to vector<4x16xf32>
    %22 = tpu.concatenate %19, %20, %21 in 0 : vector<4x16xf32>, vector<4x16xf32>, vector<4x16xf32> -> vector<12x16xf32>
    %cst_14 = arith.constant dense<0.000000e+00> : vector<8x16xf32>
    %23 = tpu.matmul %15, %22, %cst_14 {dimension_numbers = #tpu.dot_dimension_numbers<[1], [0], [0], [1], [0, 0, 1, 1], [], []>} : vector<8x12xf32>, vector<12x16xf32>, vector<8x16xf32> -> vector<8x16xf32>
    %24 = vector.broadcast %16 : vector<8x1xf32> to vector<8x16xf32>
    %25 = arith.addf %23, %24 : vector<8x16xf32>
    %cst_15 = arith.constant 5.000000e-01 : f32
    %26 = vector.broadcast %cst_15 : f32 to vector<8x16xf32>
    %27 = arith.mulf %26, %25 : vector<8x16xf32>
    %cst_16 = arith.constant 0.707106769 : f32
    %28 = vector.broadcast %cst_16 : f32 to vector<8x16xf32>
    %29 = arith.mulf %25, %28 : vector<8x16xf32>
    %30 = math.erf %29 : vector<8x16xf32>
    %cst_17 = arith.constant 1.000000e+00 : f32
    %31 = vector.broadcast %cst_17 : f32 to vector<8x16xf32>
    %32 = arith.addf %31, %30 : vector<8x16xf32>
    %33 = arith.mulf %27, %32 : vector<8x16xf32>
    %c0_18 = arith.constant 0 : index
    %c0_19 = arith.constant 0 : index
    %34 = vector.load %arg4[%c0_18, %c0_19] : memref<8x24xf32, #tpu.memory_space<vmem>>, vector<8x24xf32>
    %c0_20 = arith.constant 0 : index
    %c0_21 = arith.constant 0 : index
    %35 = vector.load %arg5[%c0_20, %c0_21] : memref<8x1xf32, #tpu.memory_space<vmem>>, vector<8x1xf32>
    %cst_22 = arith.constant 0.000000e+00 : f32
    %36 = vector.broadcast %cst_22 : f32 to vector<8x2xf32>
    %37 = tpu.concatenate %36, %33, %36 in 1 : vector<8x2xf32>, vector<8x16xf32>, vector<8x2xf32> -> vector<8x20xf32>
    %38 = vector.extract_strided_slice %37 {offsets = [0, 0], sizes = [8, 16], strides = [1, 1]} : vector<8x20xf32> to vector<8x16xf32>
    %39 = vector.extract_strided_slice %37 {offsets = [0, 2], sizes = [8, 16], strides = [1, 1]} : vector<8x20xf32> to vector<8x16xf32>
    %40 = vector.extract_strided_slice %37 {offsets = [0, 4], sizes = [8, 16], strides = [1, 1]} : vector<8x20xf32> to vector<8x16xf32>
    %41 = tpu.concatenate %38, %39, %40 in 0 : vector<8x16xf32>, vector<8x16xf32>, vector<8x16xf32> -> vector<24x16xf32>
    %cst_23 = arith.constant dense<0.000000e+00> : vector<8x16xf32>
    %42 = tpu.matmul %34, %41, %cst_23 {dimension_numbers = #tpu.dot_dimension_numbers<[1], [0], [0], [1], [0, 0, 1, 1], [], []>} : vector<8x24xf32>, vector<24x16xf32>, vector<8x16xf32> -> vector<8x16xf32>
    %43 = vector.broadcast %35 : vector<8x1xf32> to vector<8x16xf32>
    %44 = arith.addf %42, %43 : vector<8x16xf32>
    %45 = arith.addf %44, %6 : vector<8x16xf32>
    %c0_24 = arith.constant 0 : index
    %c0_25 = arith.constant 0 : index
    %c0_26 = arith.constant 0 : index
    %46 = vector.load %arg8[%c0_24, %c0_25, %c0_26] : memref<1x8x16xf32, #tpu.memory_space<vmem>>, vector<1x8x16xf32>
    %47 = vector.shape_cast %46 : vector<1x8x16xf32> to vector<8x16xf32>
    %48 = vector.shape_cast %45 : vector<8x16xf32> to vector<1x8x16xf32>
    tpu.vector_store %arg8[%c0_24, %c0_25, %c0_26], %48 {strides = array<i32>} : memref<1x8x16xf32, #tpu.memory_space<vmem>>, vector<1x8x16xf32>,
    return
  }
  func.func @transform_0(%arg0: i32) -> (i32, i32, i32) {
    %c0_i32 = arith.constant 0 : i32
    %c0_i32_0 = arith.constant 0 : i32
    %c0_i32_1 = arith.constant 0 : i32
    return %arg0, %c0_i32, %c0_i32_0 : i32, i32, i32
  }
  func.func @transform_1(%arg0: i32) -> (i32, i32) {
    %c0_i32 = arith.constant 0 : i32
    %c0_i32_0 = arith.constant 0 : i32
    %c0_i32_1 = arith.constant 0 : i32
    return %c0_i32, %c0_i32_0 : i32, i32
  }
  func.func @transform_2(%arg0: i32) -> (i32, i32) {
    %c0_i32 = arith.constant 0 : i32
    %c0_i32_0 = arith.constant 0 : i32
    %c0_i32_1 = arith.constant 0 : i32
    return %c0_i32, %c0_i32_0 : i32, i32
  }
  func.func @transform_3(%arg0: i32) -> (i32, i32) {
    %c0_i32 = arith.constant 0 : i32
    %c0_i32_0 = arith.constant 0 : i32
    %c0_i32_1 = arith.constant 0 : i32
    return %c0_i32, %c0_i32_0 : i32, i32
  }
  func.func @transform_4(%arg0: i32) -> (i32, i32) {
    %c0_i32 = arith.constant 0 : i32
    %c0_i32_0 = arith.constant 0 : i32
    %c0_i32_1 = arith.constant 0 : i32
    return %c0_i32, %c0_i32_0 : i32, i32
  }
  func.func @transform_5(%arg0: i32) -> (i32, i32) {
    %c0_i32 = arith.constant 0 : i32
    %c0_i32_0 = arith.constant 0 : i32
    %c0_i32_1 = arith.constant 0 : i32
    return %c0_i32, %c0_i32_0 : i32, i32
  }
  func.func @transform_6(%arg0: i32) -> (i32, i32) {
    %c0_i32 = arith.constant 0 : i32
    %c0_i32_0 = arith.constant 0 : i32
    %c0_i32_1 = arith.constant 0 : i32
    return %c0_i32, %c0_i32_0 : i32, i32
  }
  func.func @transform_7(%arg0: i32) -> (i32, i32, i32) {
    %c0_i32 = arith.constant 0 : i32
    %c0_i32_0 = arith.constant 0 : i32
    %c0_i32_1 = arith.constant 0 : i32
    return %arg0, %c0_i32, %c0_i32_0 : i32, i32, i32
  }
}

</mosaic_0001>

<bundles_post_ra>
// kernel: conv_block_forward.1
= control target key start
LH: loop header
LB: loop body
LE: loop exit
PB: predicated region body
PF: predicated region fallthrough
CT: control target
= control target key end

     0   :  { %12 = vsyncpa [#allocation3], 0  ;;  %s862_s0 = inlined_call_operand.vmem [shape: f32[2,4,16], index: 0, kind: input, shape index: {}]   ;;  %s863_s1 = inlined_call_operand.vmem [shape: f32[8,12], index: 1, kind: input, shape index: {}]   ;;  %s864_s2 = inlined_call_operand.vmem [shape: f32[8,1], index: 2, kind: input, shape index: {}]   ;;  %s865_s3 = inlined_call_operand.vmem [shape: f32[8,24], index: 3, kind: input, shape index: {}]   ;;  %s866_s4 = inlined_call_operand.vmem [shape: f32[8,1], index: 4, kind: input, shape index: {}]   ;;  %s867_s5 = inlined_call_operand.vmem [shape: f32[8,4], index: 5, kind: input, shape index: {}]   ;;  %s868_s6 = inlined_call_operand.vmem [shape: f32[8,1], index: 6, kind: input, shape index: {}]   ;;  %s869_s7 = inlined_call_operand.hbm [shape: f32[2,8,16], index: 7, kind: output, shape index: {}]  }
   0x1   :  { %14 = vsyncpa [#allocation3 + $0x1], 0  ;;  %s745_s24 = smov 0   ;;  %s747_s25 = smov 0  }
   0x2   :  { %s749_s26 = smov 0   ;;  %s751_s27 = smov 0  }
   0x3 LB: > { %s766_s28 = sadd.s32 4294967295, %s699_s27   ;;  %s569_s29 = sadd.s32 4294967294, %s699_s27   ;;  %s699_s27 = sphi %s751_s27, %s875_s27   ;;  %s695_s26 = sphi %s749_s26, %s874_s26   ;;  %s691_s25 = sphi %s747_s25, %s873_s25   ;;  %s687_s24 = sphi %s745_s24, %s872_s24  }
   0x4   : > { %s770_s30 = sadd.s32 1, %s699_s27   ;;  %s179_s8 = sadd.s32 1, %s695_s26 }
   0x5   : > { %s176_s9 = ssub.s32 %s699_s27, %s770_s30  ;;  %p189_p0 = scmp.ne.s32.totalorder %s695_s26, %s691_s25 }
   0x6   : > { %p177_p1 = scmp.eq.s32.totalorder %s176_s9, 0  ;;  %p190_p2 = scmp.eq.s32.totalorder %s766_s28, 1 }
   0x7   : > { %p195_p3 = scmp.ne.s32.totalorder %s691_s25, %s687_s24  ;;  %p196_p4 = scmp.eq.s32.totalorder %s569_s29, 1 }
   0x8   : > { %s781_s10 = scalar_select %p177_p1, %s695_s26, %s179_s8  }
   0x9   : > { %p783_p5 = por %p190_p2, %p189_p0  ;;  %p787_p6 = por %p196_p4, %p195_p3 }
   0xa   : > { %p572_p7 = scmp.ge.s32.totalorder %s699_s27, 1  ;;  %p239_p8 = scmp.lt.s32.totalorder %s699_s27, 3 }
   0xc   : > { %p240_p9 = pnand %p572_p7, %p239_p8 }
   0xd   : > { %p270_p10 = scmp.lt.s32.totalorder (!%p240_p9), %s766_s28, 1  ;;  %s701_s18 = smov (!%p240_p9), 2  }
   0xe   : > { %243 = sbr.rel (%p240_p9) target bundleno = 840 (0x348), region = 48  ;;  %s702_s19 = smov (!%p240_p9), 124  }
   0xf   : > { %s703_s20 = smov (!%p240_p9), 126  }
  0x13   : > { %s271_s13 = scalar_select %p270_p10, %s766_s28, 1  ;;  %vm360_vm4 = vcmask 15360   ;;  %vm362_vm5 = vcmask 146432   ;;  %vm286_vm6 = vcmask 1043456   ;;  %v275_v44 = vld [vmem:[%s867_s5] sm:$0xff]  ;;  %vm282_vm7 = vcmask 31744  }
  0x14   : > { %v355_v45 = vld [vmem:[%s864_s2] sm:$0xff]  ;;  %v704_v46 = vmov 0   ;;  %vm377_vm8 = vcmask 97280   ;;  %vm467_vm13 = vcmask 195584   ;;  %vm492_vm14 = vcmask 130048  }
  0x15   : > { %s574_s14 = sshll.u32 %s271_s13, 2  ;;  %630 = vset.pattern.permute.xlu1 %v704_v46  ;;  %631 = vset.pattern.permute.xlu2 %v704_v46  ;;  %v276_v47 = vld [vmem:[%s868_s6] sm:$0xff] }
  0x16   : > { %s273_s17 = scalar_lea.vmem %s862_s0, %s574_s14  ;;  %632 = vset.pattern.permute.xlu0 %v704_v46  ;;  %v354_v50 = vld [vmem:[%s863_s1] sm:$0xff] }
  0x17   : > { %v274_v0 = vld [vmem:[%s273_s17] sm:$0xf] }
  0x18   : > { %v311_v1 = vmul.f32 0.70710677, %v274_v0  ;;  %v310_v36 = vmul.f32 0.5, %v274_v0  ;;  %575 = vmatpush.msk.msra.mxu0 %vm286_vm6, %v274_v0 }
  0x19   : > { %576 = vmatmul.msk.f32.vlgmr.msra.gmra.mxu0 %vm282_vm7, %v275_v44 }
  0x1a   : > { %v312_v2 = vmul.f32 %v311_v1, %v311_v1 }
  0x1c   : > { %v313_v3 = vmin.f32 %v312_v2, 16.0 }
  0x1e   : > { %v314_v4 = vmul.f32 2.1237322e-06, %v313_v3  ;;  %v325_v5 = vmul.f32 3.8918573e-05, %v313_v3 }
  0x20   : > { %v315_v6 = vadd.f32 0.00028619796, %v314_v4  ;;  %v326_v7 = vadd.f32 0.001143296, %v325_v5 }
  0x22   : > { %v316_v8 = vmul.f32 %v315_v6, %v313_v3  ;;  %v327_v9 = vmul.f32 %v326_v7, %v313_v3 }
  0x24   : > { %v317_v10 = vadd.f32 0.0036580483, %v316_v8  ;;  %v328_v11 = vadd.f32 0.014752088, %v327_v9 }
  0x26   : > { %v318_v12 = vmul.f32 %v317_v10, %v313_v3  ;;  %v329_v13 = vmul.f32 %v328_v11, %v313_v3 }
  0x28   : > { %v330_v14 = vadd.f32 0.112945676, %v329_v13  ;;  %v319_v15 = vadd.f32 0.05243302, %v318_v12 }
  0x2a   : > { %v331_v16 = vmul.f32 %v330_v14, %v313_v3  ;;  %v320_v18 = vmul.f32 %v319_v15, %v313_v3 }
  0x2c   : > { %v332_v17 = vadd.f32 0.4994258, %v331_v16  ;;  %v321_v21 = vadd.f32 0.18741608, %v320_v18 }
  0x2e   : > { %v333_v19 = vmul.f32 %v332_v17, %v313_v3  ;;  %v322_v22 = vmul.f32 %v321_v21, %v313_v3 }
  0x30   : > { %v334_v20 = vadd.f32 1.0, %v333_v19  ;;  %v323_v25 = vadd.f32 1.1283791, %v322_v22 }
  0x32   : > { %633 = vrcp.f32 %v334_v20  ;;  %v346_v26 = vand.u32 2147483648, %v334_v20  ;;  %vm340_vm0 = vweird.f32 %v334_v20  ;;  %v344_v28 = vand.u32 2147483647, %v334_v20 }
  0x33   : > { %v324_v31 = vmul.f32 %v323_v25, %v311_v1 }
  0x34   : > { %v347_v30 = vor.u32 1.1754944e-38, %v346_v26  ;;  %vm345_vm3 = vcmp.eq.f32.partialorder %v344_v28, 8.507059e+37 }
  0x38   : > { %v634_v23 = vpop.eup %633 }
  0x39   : > { %v336_v24 = vmul.f32 %v634_v23, %v334_v20  ;;  %vm341_vm1 = vweird.f32 %v634_v23 }
  0x3a   : > { %vm342_vm2 = vmor %vm340_vm0, %vm341_vm1 }
  0x3b   : > { %v337_v27 = vsub.f32 1.0, %v336_v24 }
  0x3d   : > { %v338_v29 = vmul.f32 %v634_v23, %v337_v27 }
  0x3f   : > { %v339_v32 = vadd.f32 %v634_v23, %v338_v29 }
  0x41   : > { %v343_v33 = vsel %vm342_vm2, %v634_v23, %v339_v32 }
  0x42   : > { %v348_v34 = vsel %vm345_vm3, %v347_v30, %v343_v33  ;;  %v448_v33 = vld [vmem:[%s866_s4] sm:$0xff] }
  0x43   : > { %v349_v35 = vmul.f32 %v348_v34, %v324_v31 }
  0x45   : > { %v577_v37 = vclamps-f32 %v349_v35, 1.0 }
  0x47   : > { %v352_v38 = vadd.f32 1.0, %v577_v37 }
  0x49   : > { %v353_v39 = vmul.f32 %v352_v38, %v310_v36  ;;  %v447_v36 = vld [vmem:[%s865_s3] sm:$0xff] }
  0x4b   : > { %357 = vrot.lane.b32.xlu0 %v353_v39, %s701_s18 }
  0x96   : > { %v307_v38 = vpop.f32.mrf.mxu0 }
  0xbd   : > { %v358_v40 = vpop.permute.xlu0 %357 }
  0xbe   : > { %v361_v41 = vsel %vm360_vm4, 0.0, %v358_v40 }
  0xbf   : > { %v363_v42 = vsel %vm362_vm5, %v361_v41, 0.0 }
  0xc0   : > { %369 = vrot.lane.b32.xlu0 %v363_v42, %s702_s19  ;;  %v365_v43 = vrot.slane %v363_v42, 4 }
  0xc2   : > { %366 = vrot.lane.b32.xlu1 %v365_v43, %s703_s20 }
  0xca   : > { %374 = vperm.xlu1 %630, %v355_v45  }
  0xd2   : > { %279 = vperm.xlu1 %630, %v276_v47  }
 0x132   : > { %v370_v48 = vpop.permute.xlu0 %369 }
 0x133   : > { %578 = vmatpush.msk.msra.mxu1 %vm286_vm6, %v370_v48 }
 0x134   : > { %v367_v49 = vpop.permute.xlu1 %366 }
 0x135   : > { %v371_v51 = vsel %vm286_vm6, %v363_v42, %v367_v49 }
 0x136   : > { %398 = vmatpush.msra.mxu1 %v371_v51 }
 0x137   : > { %579 = vmatmul.msk.f32.vlgmr.msra.gmra.mxu1 %vm377_vm8, %v354_v50 }
 0x13c   : > { %v375_v52 = vpop.permute.xlu1 %374 }
 0x144   : > { %v280_v37 = vpop.permute.xlu1 %279 }
 0x145   : > { %v308_v41 = vadd.f32 %v307_v38, %v280_v37 }
 0x1b4   : > { %v400_v53 = vpop.f32.mrf.mxu1 }
 0x1b5   : > { %v401_v54 = vadd.f32 %v400_v53, %v375_v52 }
 0x1b7   : > { %v404_v55 = vmul.f32 0.70710677, %v401_v54  ;;  %v403_v27 = vmul.f32 0.5, %v401_v54 }
 0x1b9   : > { %v405_v56 = vmul.f32 %v404_v55, %v404_v55 }
 0x1bb   : > { %v406_v57 = vmin.f32 %v405_v56, 16.0 }
 0x1bd   : > { %v407_v58 = vmul.f32 2.1237322e-06, %v406_v57  ;;  %v418_v59 = vmul.f32 3.8918573e-05, %v406_v57 }
 0x1bf   : > { %v408_v60 = vadd.f32 0.00028619796, %v407_v58  ;;  %v419_v61 = vadd.f32 0.001143296, %v418_v59 }
 0x1c1   : > { %v409_v62 = vmul.f32 %v408_v60, %v406_v57  ;;  %v420_v63 = vmul.f32 %v419_v61, %v406_v57 }
 0x1c3   : > { %v421_v0 = vadd.f32 0.014752088, %v420_v63  ;;  %v410_v1 = vadd.f32 0.0036580483, %v409_v62 }
 0x1c5   : > { %v422_v2 = vmul.f32 %v421_v0, %v406_v57  ;;  %v411_v4 = vmul.f32 %v410_v1, %v406_v57 }
 0x1c7   : > { %v423_v3 = vadd.f32 0.112945676, %v422_v2  ;;  %v412_v7 = vadd.f32 0.05243302, %v411_v4 }
 0x1c9   : > { %v424_v5 = vmul.f32 %v423_v3, %v406_v57  ;;  %v413_v10 = vmul.f32 %v412_v7, %v406_v57 }
 0x1cb   : > { %v425_v6 = vadd.f32 0.4994258, %v424_v5  ;;  %v414_v11 = vadd.f32 0.18741608, %v413_v10 }
 0x1cd   : > { %v426_v8 = vmul.f32 %v425_v6, %v406_v57  ;;  %v415_v13 = vmul.f32 %v414_v11, %v406_v57 }
 0x1cf   : > { %v427_v9 = vadd.f32 1.0, %v426_v8  ;;  %v416_v17 = vadd.f32 1.1283791, %v415_v13 }
 0x1d1   : > { %635 = vrcp.f32 %v427_v9  ;;  %v439_v16 = vand.u32 2147483648, %v427_v9  ;;  %v437_v19 = vand.u32 2147483647, %v427_v9  ;;  %vm433_vm10 = vweird.f32 %v427_v9 }
 0x1d2   : > { %v417_v22 = vmul.f32 %v416_v17, %v404_v55 }
 0x1d3   : > { %v440_v21 = vor.u32 1.1754944e-38, %v439_v16  ;;  %vm438_vm12 = vcmp.eq.f32.partialorder %v437_v19, 8.507059e+37 }
 0x1d7   : > { %v636_v12 = vpop.eup %635 }
 0x1d8   : > { %v429_v14 = vmul.f32 %v636_v12, %v427_v9  ;;  %vm434_vm9 = vweird.f32 %v636_v12 }
 0x1d9   : > { %vm435_vm11 = vmor %vm433_vm10, %vm434_vm9 }
 0x1da   : > { %v430_v15 = vsub.f32 1.0, %v429_v14 }
 0x1dc   : > { %v431_v18 = vmul.f32 %v636_v12, %v430_v15 }
 0x1de   : > { %v432_v20 = vadd.f32 %v636_v12, %v431_v18 }
 0x1e0   : > { %v436_v23 = vsel %vm435_vm11, %v636_v12, %v432_v20 }
 0x1e1   : > { %v441_v24 = vsel %vm438_vm12, %v440_v21, %v436_v23 }
 0x1e2   : > { %v442_v25 = vmul.f32 %v441_v24, %v417_v22 }
 0x1e4   : > { %v580_v26 = vclamps-f32 %v442_v25, 1.0 }
 0x1e6   : > { %v445_v28 = vadd.f32 1.0, %v580_v26 }
 0x1e8   : > { %v446_v29 = vmul.f32 %v445_v28, %v403_v27 }
 0x1ea   : > { %450 = vrot.lane.b32.xlu2 %v446_v29, %s701_s18  ;;  %s657_s18 = scalar_lea.hbm %s869_s7, 16 }
 0x244   : > { %v451_v30 = vpop.permute.xlu2 %450 }
 0x245   : > { %v453_v31 = vsel %vm360_vm4, 0.0, %v451_v30 }
 0x246   : > { %v454_v32 = vsel %vm362_vm5, %v453_v31, 0.0 }
 0x247   : > { %456 = vrot.lane.b32.xlu0 %v454_v32, %s703_s20  ;;  %459 = vrot.lane.b32.xlu2 %v454_v32, %s702_s19  ;;  %s267_s20 = sand.u32 1, %s691_s25   ;;  %s584_s19 = sshll.u32 %s766_s28, 3 }
 0x248   : > { %s573_s21 = sshll.u32 %s267_s20, 3  ;;  %s505_s29 = scalar_lea.hbm %s869_s7, %s584_s19 }
 0x249   : > { %s269_s8 = scalar_lea.vmem [#allocation2], %s573_s21  ;;  %s509_s13 = sshll.u32 %s505_s29, 4  ;;  %s510_s13 = int_to_ptr.hbm [resolvable:$true] %s509_s13 }
 0x24a   : > { %s507_s9 = sshll.u32 %s269_s8, 4  ;;  %s495_s28 = scalar_lea.sflag [#allocation3], %s267_s20  ;;  %s508_s9 = int_to_ptr.vmem [resolvable:$true] %s507_s9 }
 0x24b   : > { %s651_s14 = sshra.s32 %s510_s13, 4  ;;  %s652_s14 = int_to_ptr.hbm [resolvable:$true] %s651_s14 }
 0x24c   : > { %s653_s15 = scalar_lea.hbm %s652_s14, 8  ;;  %p658_p0 = scmp.lt.s32.totalorder %s652_s14, %s869_s7 }
 0x24d   : > { %p654_p11 = scmp.ne.s32.totalorder %s652_s14, %s653_s15  ;;  %p659_p1 = scmp.lt.s32.totalorder %s657_s18, %s653_s15 }
 0x24f   : > { %464 = vperm.xlu2 %631, %v448_v33   ;;  %p655_p12 = pnand %p654_p11, %p783_p5  ;;  %p660_p2 = por %p659_p1, %p658_p0 }
 0x251   : > { %p656_p13 = pneg %p655_p12 }
 0x253   : > { %p661_p3 = pnand %p660_p2, %p656_p13 }
 0x2a1   : > { %v460_v34 = vpop.permute.xlu2 %459 }
 0x2a2   : > { %484 = vmatpush.msra.mxu2 %v460_v34 }
 0x2a9   : > { %v465_v39 = vpop.permute.xlu2 %464 }
 0x2b9   : > { %v457_v35 = vpop.permute.xlu0 %456 }
 0x2ba   : > { %485 = vmatpush.msra.mxu2 %v457_v35 }
 0x2bc   : > { %581 = vmatpush.msk.msra.mxu2 %vm362_vm5, %v453_v31 }
 0x2bd   : > { %582 = vmatmul.msk.f32.vlgmr.msra.gmra.mxu2 %vm467_vm13, %v447_v36 }
 0x340   : > { %v488_v40 = vpop.f32.mrf.mxu2 }
 0x341   : > { %v489_v42 = vadd.f32 %v488_v40, %v465_v39 }
 0x343   : > { %v491_v43 = vadd.f32 %v489_v42, %v308_v41 }
 0x345   : > { %493 = vst.msk [vmem:[%s269_s8] sm:$0xff] %vm492_vm14, %v491_v43 }
 0x346   : > { %664 = shalt.err (!%p661_p3)
}
 0x347   : > { %587 = dma.vmem_to_hbm [thread:$0]  (%p783_p5), %s508_s9, 128, %s510_s13, %s495_s28  }
 0x348 PF: > { %p593_p4 = scmp.ge.s32.totalorder %s699_s27, 2  ;;  %s521_s20 = sand.u32 1, %s687_s24  }
 0x349   : > { %s522_s22 = scalar_lea.sflag [#allocation3], %s521_s20 }
 0x34a   : > { %p590_p7 = pnand %p593_p4, %p787_p6 }
 0x34c   : > { %p591_p8 = pneg %p590_p7 }
 0x34e   : > { %682 = dma.done.wait (%p591_p8), %s522_s22, 128  }
 0x34f   : > { %684 = vsyncadd (%p591_p8), %s522_s22, 4294967168  ;;  %p17_p9 = scmp.ge.s32.totalorder %s770_s30, 4   ;;  %s872_s24 = smov %s691_s25 }
 0x350   : > { %s873_s25 = smov %s695_s26  ;;  %s874_s26 = smov %s781_s10 }
 0x351   : > { %s875_s27 = smov %s770_s30  ;;  %19 = sbr.rel (!%p17_p9) target bundleno = 3 (0x3), region = 83 }
 0x356   :  { %528 = vsyncpa [#allocation3], 1 }
 0x357   :  { %530 = vsyncpa [#allocation3 + $0x1], 1 }

</bundles_post_ra>
